<compile_context>
chip_gen: v7x
topology: tpu7x:2x2x1
jax: 0.10.0
libtpu: 0.0.40
codegen_flags: <defaults>
</compile_context>

<pallas_src>
import functools

import jax
import jax.numpy as jnp
from jax.experimental import pallas as pl
from jax.experimental.pallas import tpu as pltpu


def rtvf_kernel(idx_ref, c_ref, mmu_r_ref, mmu_c_ref, h_ref, b_ref, v_ref,
                o_ref, *, n_channels, k):
    """One grid step == (row tile r, batch element b).

    Ref shapes (per grid step):
      idx_ref   : (bs,) int32             scalar-prefetch, SMEM
      c_ref     : (n_frames, k) f32       whole C table, SMEM
      mmu_r_ref : (1, tr, nx)             Mmu[frame, r*tr:(r+1)*tr, :]
      mmu_c_ref : (1, nx, tr)             Mmu[frame, :, r*tr:(r+1)*tr]
      h_ref     : (1, nc, tr, nx)         H[frame] row tile (channels-first)
      b_ref     : (nc, tr, nx)            B row tile (shared across frames)
      v_ref     : (k, nc, tr, nx)         V row tile (shared across frames)
      o_ref     : (1, nc, tr, nx)         output row tile (channels-first)
    """
    b = pl.program_id(1)
    frame = idx_ref[b]

    # mask rows [r*tr, (r+1)*tr) of sigmoid(Mmu + Mmu^T)  -> (tr, nx)
    m = jax.nn.sigmoid(mmu_r_ref[0] + mmu_c_ref[0].T)
    one_minus_m = 1.0 - m

    # per-frame mixing coefficients: scalar reads from SMEM (no vreg lane
    # extraction, no broadcast intermediate)
    coeffs = [c_ref[frame, kk] for kk in range(k)]

    for c in range(n_channels):
        s = b_ref[c]                                   # (tr, nx)
        for kk in range(k):                            # scalar * tile FMAs
            s = s + coeffs[kk] * v_ref[kk, c]
        o_ref[0, c] = s * one_minus_m + h_ref[0, c] * m


def _choose_row_tile(nx, nc, k, budget_bytes=24 * 1024 * 1024):
    """Largest row tile (multiple of 128, or the full frame) fitting a
    conservative double-buffered VMEM budget (safe on v7x's 64 MiB)."""
    def db_footprint(tr):
        # H + out + B + V + (Mmu row + col), f32, x2 for double buffering
        per_step = 4 * tr * nx * (3 * nc + k * nc + 2)
        return 2 * per_step

    for tr in (512, 256, 128):
        if nx % tr == 0 and db_footprint(tr) <= budget_bytes:
            return tr
    if nx % 128 == 0:
        return 128
    return nx  # small images: one whole frame of rows per step


def rtvf_forward(params, index, img=None):
    del img  # forward() ignores img, matching the PyTorch module
    B, V, C, Mmu, H = (params["B"], params["V"], params["C"],
                       params["Mmu"], params["H"])
    k, nx, _, nc = V.shape
    n_frames = C.shape[0]
    bs = index.shape[0]
    # The module broadcasts B (.., 3) against cV (.., nc); requires nc == 3.
    assert B.shape[-1] == nc, "B channel count must match V/H channels"

    tr = _choose_row_tile(nx, nc, k)
    n_row_tiles = nx // tr

    # channels-first compute layout: lane axis = image width (lane-dense)
    B_cf = jnp.transpose(B, (2, 0, 1))        # (nc, nx, nx)
    V_cf = jnp.transpose(V, (0, 3, 1, 2))     # (k, nc, nx, nx)
    H_cf = jnp.transpose(H, (0, 3, 1, 2))     # (n_frames, nc, nx, nx)

    kernel = functools.partial(rtvf_kernel, n_channels=nc, k=k)

    grid_spec = pltpu.PrefetchScalarGridSpec(
        num_scalar_prefetch=1,                # `index` -> SMEM, drives gathers
        grid=(n_row_tiles, bs),               # rows outer, frames inner
        in_specs=[
            # C table: whole array in SMEM, scalar-indexed inside the kernel
            pl.BlockSpec(memory_space=pltpu.MemorySpace.SMEM),
            # Mmu row block and Mmu column block (for the transpose term)
            pl.BlockSpec((1, tr, nx), lambda r, b, idx: (idx[b], r, 0)),
            pl.BlockSpec((1, nx, tr), lambda r, b, idx: (idx[b], 0, r)),
            # gathered per-frame hard image row tile
            pl.BlockSpec((1, nc, tr, nx), lambda r, b, idx: (idx[b], 0, r, 0)),
            # shared (frame-invariant) tensors: fetched once per row tile
            pl.BlockSpec((nc, tr, nx), lambda r, b, idx: (0, r, 0)),
            pl.BlockSpec((k, nc, tr, nx), lambda r, b, idx: (0, 0, r, 0)),
        ],
        out_specs=pl.BlockSpec((1, nc, tr, nx), lambda r, b, idx: (b, 0, r, 0)),
    )

    cost = pl.CostEstimate(
        flops=int(bs * nx * nx * (1 + nc * (2 * k + 3))),
        transcendentals=int(bs * nx * nx),
        bytes_accessed=int(4 * (2 * bs * nc * nx * nx      # H read + out write
                                + 2 * bs * nx * nx         # Mmu row + col
                                + (k + 1) * nc * nx * nx   # V + B (~once)
                                + n_frames * k)),          # C table
    )

    out_cf = pl.pallas_call(
        kernel,
        out_shape=jax.ShapeDtypeStruct((bs, nc, nx, nx), jnp.float32),
        grid_spec=grid_spec,
        compiler_params=pltpu.CompilerParams(
            dimension_semantics=("parallel", "parallel")),
        cost_estimate=cost,
    )(index.astype(jnp.int32), C, Mmu, Mmu, H_cf, B_cf, V_cf)

    # back to the module's NHWC layout for the caller
    return jnp.transpose(out_cf, (0, 2, 3, 1))


def rtvf_reference(params, index):
    """Pure-JAX reference matching the PyTorch forward (fused == identity)."""
    B, V, C, Mmu, H = (params["B"], params["V"], params["C"],
                       params["Mmu"], params["H"])
    cV = jnp.einsum("bk,kxyc->bxyc", C[index], V)
    S = B[None] + cV
    Hh = H[index]
    mu = Mmu[index]
    M = jax.nn.sigmoid(mu + jnp.transpose(mu, (0, 2, 1)))[..., None]
    return S * (1.0 - M) + Hh * M


def make_params(key, n_frames, n_pixels, n_channels, k):
    ks = jax.random.split(key, 5)
    return {
        "B": jax.random.normal(ks[0], (n_pixels, n_pixels, 3), jnp.float32),
        "V": jax.random.normal(ks[1], (k, n_pixels, n_pixels, n_channels),
                               jnp.float32),
        "C": jax.random.normal(ks[2], (n_frames, k), jnp.float32),
        "Mmu": jax.random.normal(ks[3], (n_frames, n_pixels, n_pixels),
                                 jnp.float32) - 2.0,
        "H": jax.random.normal(ks[4], (n_frames, n_pixels, n_pixels, n_channels),
                               jnp.float32),
    }


if __name__ == "__main__":
    n_frames, n_pixels, n_channels, k = 8, 16, 3, 2
    bs = 2

    key = jax.random.PRNGKey(0)
    pkey, ikey = jax.random.split(key)
    params = make_params(pkey, n_frames, n_pixels, n_channels, k)

    index = jnp.array([1, 5], dtype=jnp.int32)                   # (bs,)
    img = jax.random.normal(ikey, (bs, n_pixels, n_pixels, n_channels),
                            jnp.float32)  # unused by forward, kept for parity

    out = rtvf_forward(params, index, img)
    out = jax.block_until_ready(out)

    ref = rtvf_reference(params, index)
    assert out.shape == (bs, n_pixels, n_pixels, n_channels)
    assert jnp.allclose(out, ref, atol=1e-5, rtol=1e-5), "mismatch vs reference"

    print("KERNEL_OK")
</pallas_src>

<mosaic_0001>
module attributes {stable_mosaic.version = 11 : i64} {
  func.func @rtvf_kernel(%arg0: i32, %arg1: i32, %arg2: memref<2xi32, #tpu.memory_space<smem>>, %arg3: memref<8x2xf32, #tpu.memory_space<smem>>, %arg4: memref<1x16x16xf32, #tpu.memory_space<vmem>>, %arg5: memref<1x16x16xf32, #tpu.memory_space<vmem>>, %arg6: memref<1x3x16x16xf32, #tpu.memory_space<vmem>>, %arg7: memref<3x16x16xf32, #tpu.memory_space<vmem>>, %arg8: memref<2x3x16x16xf32, #tpu.memory_space<vmem>>, %arg9: memref<1x3x16x16xf32, #tpu.memory_space<vmem>>) attributes {dimension_semantics = [#tpu.dimension_semantics<parallel>, #tpu.dimension_semantics<parallel>], iteration_bounds = array<i64: 1, 2>, scalar_prefetch = 1 : i64, scratch_operands = 0 : i64, tpu.core_type = #tpu.core_type<tc>, window_params = [{transform_indices = @transform_0, window_bounds = array<i64: 8, 2>}, {transform_indices = @transform_1, window_bounds = array<i64: 1, 16, 16>}, {transform_indices = @transform_2, window_bounds = array<i64: 1, 16, 16>}, {transform_indices = @transform_3, window_bounds = array<i64: 1, 3, 16, 16>}, {transform_indices = @transform_4, window_bounds = array<i64: 3, 16, 16>}, {transform_indices = @transform_5, window_bounds = array<i64: 2, 3, 16, 16>}, {transform_indices = @transform_6, window_bounds = array<i64: 1, 3, 16, 16>}]} {
    %0 = arith.index_cast %arg1 : i32 to index
    %1 = memref.load %arg2[%0] : memref<2xi32, #tpu.memory_space<smem>>
    %c0 = arith.constant 0 : index
    %c0_0 = arith.constant 0 : index
    %c0_1 = arith.constant 0 : index
    %2 = vector.load %arg4[%c0, %c0_0, %c0_1] : memref<1x16x16xf32, #tpu.memory_space<vmem>>, vector<1x16x16xf32>
    %3 = vector.shape_cast %2 : vector<1x16x16xf32> to vector<16x16xf32>
    %c0_2 = arith.constant 0 : index
    %c0_3 = arith.constant 0 : index
    %c0_4 = arith.constant 0 : index
    %4 = vector.load %arg5[%c0_2, %c0_3, %c0_4] : memref<1x16x16xf32, #tpu.memory_space<vmem>>, vector<1x16x16xf32>
    %5 = vector.shape_cast %4 : vector<1x16x16xf32> to vector<16x16xf32>
    %6 = tpu.transpose %5, [1, 0] : vector<16x16xf32> -> vector<16x16xf32>
    %7 = arith.addf %3, %6 : vector<16x16xf32>
    %8 = arith.negf %7 : vector<16x16xf32>
    %9 = math.exp %8 : vector<16x16xf32>
    %cst = arith.constant 1.000000e+00 : f32
    %10 = vector.broadcast %cst : f32 to vector<16x16xf32>
    %11 = arith.addf %10, %9 : vector<16x16xf32>
    %12 = arith.divf %10, %11 : vector<16x16xf32>
    %cst_5 = arith.constant 1.000000e+00 : f32
    %13 = vector.broadcast %cst_5 : f32 to vector<16x16xf32>
    %14 = arith.subf %13, %12 : vector<16x16xf32>
    %15 = arith.index_cast %1 : i32 to index
    %c0_6 = arith.constant 0 : index
    %16 = memref.load %arg3[%15, %c0_6] : memref<8x2xf32, #tpu.memory_space<smem>>
    %17 = arith.index_cast %1 : i32 to index
    %c1 = arith.constant 1 : index
    %18 = memref.load %arg3[%17, %c1] : memref<8x2xf32, #tpu.memory_space<smem>>
    %c0_7 = arith.constant 0 : index
    %c0_8 = arith.constant 0 : index
    %c0_9 = arith.constant 0 : index
    %19 = vector.load %arg7[%c0_7, %c0_8, %c0_9] : memref<3x16x16xf32, #tpu.memory_space<vmem>>, vector<1x16x16xf32>
    %20 = vector.shape_cast %19 : vector<1x16x16xf32> to vector<16x16xf32>
    %c0_10 = arith.constant 0 : index
    %c0_11 = arith.constant 0 : index
    %c0_12 = arith.constant 0 : index
    %c0_13 = arith.constant 0 : index
    %21 = vector.load %arg8[%c0_10, %c0_11, %c0_12, %c0_13] : memref<2x3x16x16xf32, #tpu.memory_space<vmem>>, vector<1x1x16x16xf32>
    %22 = vector.shape_cast %21 : vector<1x1x16x16xf32> to vector<16x16xf32>
    %23 = vector.broadcast %16 : f32 to vector<16x16xf32>
    %24 = arith.mulf %23, %22 : vector<16x16xf32>
    %25 = arith.addf %20, %24 : vector<16x16xf32>
    %c1_14 = arith.constant 1 : index
    %c0_15 = arith.constant 0 : index
    %c0_16 = arith.constant 0 : index
    %c0_17 = arith.constant 0 : index
    %26 = vector.load %arg8[%c1_14, %c0_15, %c0_16, %c0_17] : memref<2x3x16x16xf32, #tpu.memory_space<vmem>>, vector<1x1x16x16xf32>
    %27 = vector.shape_cast %26 : vector<1x1x16x16xf32> to vector<16x16xf32>
    %28 = vector.broadcast %18 : f32 to vector<16x16xf32>
    %29 = arith.mulf %28, %27 : vector<16x16xf32>
    %30 = arith.addf %25, %29 : vector<16x16xf32>
    %31 = arith.mulf %30, %14 : vector<16x16xf32>
    %c0_18 = arith.constant 0 : index
    %c0_19 = arith.constant 0 : index
    %c0_20 = arith.constant 0 : index
    %c0_21 = arith.constant 0 : index
    %32 = vector.load %arg6[%c0_18, %c0_19, %c0_20, %c0_21] : memref<1x3x16x16xf32, #tpu.memory_space<vmem>>, vector<1x1x16x16xf32>
    %33 = vector.shape_cast %32 : vector<1x1x16x16xf32> to vector<16x16xf32>
    %34 = arith.mulf %33, %12 : vector<16x16xf32>
    %35 = arith.addf %31, %34 : vector<16x16xf32>
    %c0_22 = arith.constant 0 : index
    %c0_23 = arith.constant 0 : index
    %c0_24 = arith.constant 0 : index
    %c0_25 = arith.constant 0 : index
    %36 = vector.load %arg9[%c0_22, %c0_23, %c0_24, %c0_25] : memref<1x3x16x16xf32, #tpu.memory_space<vmem>>, vector<1x1x16x16xf32>
    %37 = vector.shape_cast %36 : vector<1x1x16x16xf32> to vector<16x16xf32>
    %38 = vector.shape_cast %35 : vector<16x16xf32> to vector<1x1x16x16xf32>
    tpu.vector_store %arg9[%c0_22, %c0_23, %c0_24, %c0_25], %38 {strides = array<i32>} : memref<1x3x16x16xf32, #tpu.memory_space<vmem>>, vector<1x1x16x16xf32>,
    %c1_26 = arith.constant 1 : index
    %c0_27 = arith.constant 0 : index
    %c0_28 = arith.constant 0 : index
    %39 = vector.load %arg7[%c1_26, %c0_27, %c0_28] : memref<3x16x16xf32, #tpu.memory_space<vmem>>, vector<1x16x16xf32>
    %40 = vector.shape_cast %39 : vector<1x16x16xf32> to vector<16x16xf32>
    %c0_29 = arith.constant 0 : index
    %c1_30 = arith.constant 1 : index
    %c0_31 = arith.constant 0 : index
    %c0_32 = arith.constant 0 : index
    %41 = vector.load %arg8[%c0_29, %c1_30, %c0_31, %c0_32] : memref<2x3x16x16xf32, #tpu.memory_space<vmem>>, vector<1x1x16x16xf32>
    %42 = vector.shape_cast %41 : vector<1x1x16x16xf32> to vector<16x16xf32>
    %43 = vector.broadcast %16 : f32 to vector<16x16xf32>
    %44 = arith.mulf %43, %42 : vector<16x16xf32>
    %45 = arith.addf %40, %44 : vector<16x16xf32>
    %c1_33 = arith.constant 1 : index
    %c1_34 = arith.constant 1 : index
    %c0_35 = arith.constant 0 : index
    %c0_36 = arith.constant 0 : index
    %46 = vector.load %arg8[%c1_33, %c1_34, %c0_35, %c0_36] : memref<2x3x16x16xf32, #tpu.memory_space<vmem>>, vector<1x1x16x16xf32>
    %47 = vector.shape_cast %46 : vector<1x1x16x16xf32> to vector<16x16xf32>
    %48 = vector.broadcast %18 : f32 to vector<16x16xf32>
    %49 = arith.mulf %48, %47 : vector<16x16xf32>
    %50 = arith.addf %45, %49 : vector<16x16xf32>
    %51 = arith.mulf %50, %14 : vector<16x16xf32>
    %c0_37 = arith.constant 0 : index
    %c1_38 = arith.constant 1 : index
    %c0_39 = arith.constant 0 : index
    %c0_40 = arith.constant 0 : index
    %52 = vector.load %arg6[%c0_37, %c1_38, %c0_39, %c0_40] : memref<1x3x16x16xf32, #tpu.memory_space<vmem>>, vector<1x1x16x16xf32>
    %53 = vector.shape_cast %52 : vector<1x1x16x16xf32> to vector<16x16xf32>
    %54 = arith.mulf %53, %12 : vector<16x16xf32>
    %55 = arith.addf %51, %54 : vector<16x16xf32>
    %c0_41 = arith.constant 0 : index
    %c1_42 = arith.constant 1 : index
    %c0_43 = arith.constant 0 : index
    %c0_44 = arith.constant 0 : index
    %56 = vector.load %arg9[%c0_41, %c1_42, %c0_43, %c0_44] : memref<1x3x16x16xf32, #tpu.memory_space<vmem>>, vector<1x1x16x16xf32>
    %57 = vector.shape_cast %56 : vector<1x1x16x16xf32> to vector<16x16xf32>
    %58 = vector.shape_cast %55 : vector<16x16xf32> to vector<1x1x16x16xf32>
    tpu.vector_store %arg9[%c0_41, %c1_42, %c0_43, %c0_44], %58 {strides = array<i32>} : memref<1x3x16x16xf32, #tpu.memory_space<vmem>>, vector<1x1x16x16xf32>,
    %c2 = arith.constant 2 : index
    %c0_45 = arith.constant 0 : index
    %c0_46 = arith.constant 0 : index
    %59 = vector.load %arg7[%c2, %c0_45, %c0_46] : memref<3x16x16xf32, #tpu.memory_space<vmem>>, vector<1x16x16xf32>
    %60 = vector.shape_cast %59 : vector<1x16x16xf32> to vector<16x16xf32>
    %c0_47 = arith.constant 0 : index
    %c2_48 = arith.constant 2 : index
    %c0_49 = arith.constant 0 : index
    %c0_50 = arith.constant 0 : index
    %61 = vector.load %arg8[%c0_47, %c2_48, %c0_49, %c0_50] : memref<2x3x16x16xf32, #tpu.memory_space<vmem>>, vector<1x1x16x16xf32>
    %62 = vector.shape_cast %61 : vector<1x1x16x16xf32> to vector<16x16xf32>
    %63 = vector.broadcast %16 : f32 to vector<16x16xf32>
    %64 = arith.mulf %63, %62 : vector<16x16xf32>
    %65 = arith.addf %60, %64 : vector<16x16xf32>
    %c1_51 = arith.constant 1 : index
    %c2_52 = arith.constant 2 : index
    %c0_53 = arith.constant 0 : index
    %c0_54 = arith.constant 0 : index
    %66 = vector.load %arg8[%c1_51, %c2_52, %c0_53, %c0_54] : memref<2x3x16x16xf32, #tpu.memory_space<vmem>>, vector<1x1x16x16xf32>
    %67 = vector.shape_cast %66 : vector<1x1x16x16xf32> to vector<16x16xf32>
    %68 = vector.broadcast %18 : f32 to vector<16x16xf32>
    %69 = arith.mulf %68, %67 : vector<16x16xf32>
    %70 = arith.addf %65, %69 : vector<16x16xf32>
    %71 = arith.mulf %70, %14 : vector<16x16xf32>
    %c0_55 = arith.constant 0 : index
    %c2_56 = arith.constant 2 : index
    %c0_57 = arith.constant 0 : index
    %c0_58 = arith.constant 0 : index
    %72 = vector.load %arg6[%c0_55, %c2_56, %c0_57, %c0_58] : memref<1x3x16x16xf32, #tpu.memory_space<vmem>>, vector<1x1x16x16xf32>
    %73 = vector.shape_cast %72 : vector<1x1x16x16xf32> to vector<16x16xf32>
    %74 = arith.mulf %73, %12 : vector<16x16xf32>
    %75 = arith.addf %71, %74 : vector<16x16xf32>
    %c0_59 = arith.constant 0 : index
    %c2_60 = arith.constant 2 : index
    %c0_61 = arith.constant 0 : index
    %c0_62 = arith.constant 0 : index
    %76 = vector.load %arg9[%c0_59, %c2_60, %c0_61, %c0_62] : memref<1x3x16x16xf32, #tpu.memory_space<vmem>>, vector<1x1x16x16xf32>
    %77 = vector.shape_cast %76 : vector<1x1x16x16xf32> to vector<16x16xf32>
    %78 = vector.shape_cast %75 : vector<16x16xf32> to vector<1x1x16x16xf32>
    tpu.vector_store %arg9[%c0_59, %c2_60, %c0_61, %c0_62], %78 {strides = array<i32>} : memref<1x3x16x16xf32, #tpu.memory_space<vmem>>, vector<1x1x16x16xf32>,
    return
  }
  func.func @transform_0(%arg0: i32, %arg1: i32, %arg2: memref<2xi32, #tpu.memory_space<smem>>) -> (i32, i32) {
    %c0_i32 = arith.constant 0 : i32
    %c0_i32_0 = arith.constant 0 : i32
    %c0_i32_1 = arith.constant 0 : i32
    return %c0_i32, %c0_i32_0 : i32, i32
  }
  func.func @transform_1(%arg0: i32, %arg1: i32, %arg2: memref<2xi32, #tpu.memory_space<smem>>) -> (i32, i32, i32) {
    %0 = arith.index_cast %arg1 : i32 to index
    %1 = memref.load %arg2[%0] : memref<2xi32, #tpu.memory_space<smem>>
    %c0_i32 = arith.constant 0 : i32
    %c0_i32_0 = arith.constant 0 : i32
    return %1, %arg0, %c0_i32 : i32, i32, i32
  }
  func.func @transform_2(%arg0: i32, %arg1: i32, %arg2: memref<2xi32, #tpu.memory_space<smem>>) -> (i32, i32, i32) {
    %0 = arith.index_cast %arg1 : i32 to index
    %1 = memref.load %arg2[%0] : memref<2xi32, #tpu.memory_space<smem>>
    %c0_i32 = arith.constant 0 : i32
    %c0_i32_0 = arith.constant 0 : i32
    return %1, %c0_i32, %arg0 : i32, i32, i32
  }
  func.func @transform_3(%arg0: i32, %arg1: i32, %arg2: memref<2xi32, #tpu.memory_space<smem>>) -> (i32, i32, i32, i32) {
    %0 = arith.index_cast %arg1 : i32 to index
    %1 = memref.load %arg2[%0] : memref<2xi32, #tpu.memory_space<smem>>
    %c0_i32 = arith.constant 0 : i32
    %c0_i32_0 = arith.constant 0 : i32
    %c0_i32_1 = arith.constant 0 : i32
    return %1, %c0_i32, %arg0, %c0_i32_0 : i32, i32, i32, i32
  }
  func.func @transform_4(%arg0: i32, %arg1: i32, %arg2: memref<2xi32, #tpu.memory_space<smem>>) -> (i32, i32, i32) {
    %c0_i32 = arith.constant 0 : i32
    %c0_i32_0 = arith.constant 0 : i32
    %c0_i32_1 = arith.constant 0 : i32
    return %c0_i32, %arg0, %c0_i32_0 : i32, i32, i32
  }
  func.func @transform_5(%arg0: i32, %arg1: i32, %arg2: memref<2xi32, #tpu.memory_space<smem>>) -> (i32, i32, i32, i32) {
    %c0_i32 = arith.constant 0 : i32
    %c0_i32_0 = arith.constant 0 : i32
    %c0_i32_1 = arith.constant 0 : i32
    %c0_i32_2 = arith.constant 0 : i32
    return %c0_i32, %c0_i32_0, %arg0, %c0_i32_1 : i32, i32, i32, i32
  }
  func.func @transform_6(%arg0: i32, %arg1: i32, %arg2: memref<2xi32, #tpu.memory_space<smem>>) -> (i32, i32, i32, i32) {
    %c0_i32 = arith.constant 0 : i32
    %c0_i32_0 = arith.constant 0 : i32
    %c0_i32_1 = arith.constant 0 : i32
    return %arg1, %c0_i32, %arg0, %c0_i32_0 : i32, i32, i32, i32
  }
}

</mosaic_0001>

<bundles_post_ra>
// kernel: tpu_custom_call.1
= control target key start
LH: loop header
LB: loop body
LE: loop exit
PB: predicated region body
PF: predicated region fallthrough
CT: control target
= control target key end

     0   :  { %s1971_s0 = inlined_call_operand.vmem [shape: s32[2], index: 0, kind: input, shape index: {}]   ;;  %s1972_s1 = inlined_call_operand.vmem [shape: f32[8,2], index: 1, kind: input, shape index: {}]   ;;  %s1973_s2 = inlined_call_operand.hbm [shape: f32[8,16,16], index: 2, kind: input, shape index: {}]   ;;  %s1974_s3 = inlined_call_operand.hbm [shape: f32[8,16,16], index: 3, kind: input, shape index: {}]   ;;  %s1975_s4 = inlined_call_operand.hbm [shape: f32[8,3,16,16], index: 4, kind: input, shape index: {}]   ;;  %s1976_s5 = inlined_call_operand.hbm [shape: f32[3,16,16], index: 5, kind: input, shape index: {}]   ;;  %s1977_s6 = inlined_call_operand.hbm [shape: f32[2,3,16,16], index: 6, kind: input, shape index: {}]   ;;  %s1978_s7 = inlined_call_operand.hbm [shape: f32[2,3,16,16], index: 7, kind: output, shape index: {}]  }
   0x1   :  { %2005 = sst [smem:[#allocation39_spill]] %s1972_s1  ;;  %s12_s26 = sshll.u32 %s1971_s0, 4  ;;  %s13_s26 = int_to_ptr.vmem [resolvable:$true] %s12_s26 }
   0x2   :  { %2006 = sst [smem:[#allocation40_spill]] %s1973_s2  ;;  %s1026_s27 = scalar_lea.vmem %s13_s26, 16 }
   0x3   :  { %2007 = sst [smem:[#allocation41_spill]] %s1974_s3  ;;  %p1027_p0 = scmp.ne.s32.totalorder %s13_s26, %s1026_s27 }
   0x4   :  { %2008 = sst [smem:[#allocation42_spill]] %s1975_s4  ;;  %p1031_p1 = scmp.lt.s32.totalorder %s13_s26, %s13_s26 }
   0x5   :  { %2009 = sst [smem:[#allocation43_spill]] %s1976_s5  ;;  %p1032_p2 = scmp.lt.s32.totalorder %s1026_s27, %s1026_s27 }
   0x6   :  { %2010 = sst [smem:[#allocation44_spill]] %s1977_s6 }
   0x7   :  { %2011 = sst [smem:[#allocation45_spill]] %s1978_s7  ;;  %p1033_p3 = por %p1032_p2, %p1031_p1 }
   0x9   :  { %p1034_p4 = pnand %p1033_p3, %p1027_p0 }
   0xb   :  { %1037 = shalt.err (!%p1034_p4)  }
   0xc   :  { %s1373_s28 = smov [#allocation3]  }
   0xd   :  { %15 = dma.vmem_to_smem %s13_s26, 16, %s1373_s28, [#allocation2] }
   0xe   :  { %1287 = dma.done.wait [#allocation2], 16 }
   0xf   :  { %1288 = vsyncadd [#allocation2], 4294967280 }
  0x10   :  { %17 = sfence }
  0x11   :  { %18 = vsyncpa [#allocation7], 0 }
  0x12   :  { %19 = vsyncpa [#allocation5], 0 }
  0x13   :  { %21 = vsyncpa [#allocation5 + $0x1], 0 }
  0x14   :  { %22 = vsyncpa [#allocation10], 0 }
  0x15   :  { %24 = vsyncpa [#allocation10 + $0x1], 0 }
  0x16   :  { %25 = vsyncpa [#allocation13], 0 }
  0x17   :  { %26 = vsyncpa [#allocation6], 0 }
  0x18   :  { %28 = vsyncpa [#allocation6 + $0x1], 0  ;;  %s1428_s0 = smov 0   ;;  %s1430_s29 = smov 0  }
  0x19   :  { %s1432_s30 = smov 0   ;;  %s1434_s8 = smov 0  }
  0x1a   :  { %s1436_s9 = smov 0   ;;  %s1438_s10 = smov 0  }
  0x1b   :  { %s1440_s11 = smov 0   ;;  %s1442_s12 = smov 0  }
  0x1c   :  { %s1444_s13 = smov 0   ;;  %s1446_s14 = smov 0  }
  0x1d   :  { %s1448_s15 = smov 0   ;;  %s1450_s16 = smov 0  }
  0x1e   :  { %s1452_s17 = smov 0   ;;  %s1454_s18 = smov 0  }
  0x1f   :  { %s1456_s19 = smov 0  }
  0x20 LB: > { %2012 = sst [smem:[#allocation29_spill]] %s1315_s0  ;;  %s1504_s20 = sadd.s32 4294967295, %s1371_s19   ;;  %s1371_s19 = sphi %s1456_s19, %s34_s19   ;;  %s1367_s18 = sphi %s1454_s18, %s2095_s18   ;;  %s1363_s17 = sphi %s1452_s17, %s2094_s17   ;;  %s1359_s16 = sphi %s1450_s16, %s2093_s16   ;;  %s1355_s15 = sphi %s1448_s15, %s2092_s15   ;;  %s1351_s14 = sphi %s1446_s14, %s2091_s14   ;;  %s1347_s13 = sphi %s1444_s13, %s2090_s13   ;;  %s1343_s12 = sphi %s1442_s12, %s2089_s12   ;;  %s1339_s11 = sphi %s1440_s11, %s2083_s11   ;;  %s1335_s10 = sphi %s1438_s10, %s2088_s10   ;;  %s1331_s9 = sphi %s1436_s9, %s2087_s9   ;;  %s1327_s8 = sphi %s1434_s8, %s2086_s8   ;;  %s1323_s30 = sphi %s1432_s30, %s2082_s30   ;;  %s1319_s29 = sphi %s1430_s29, %s2085_s29   ;;  %s1315_s0 = sphi %s1428_s0, %s2080_s0  }
  0x21   : > { %2013 = sst [smem:[#allocation30_spill]] %s1319_s29  ;;  %s785_s21 = sadd.s32 4294967294, %s1371_s19  }
  0x22   : > { %2014 = sst [smem:[#allocation31_spill]] %s1323_s30  ;;  %s43_s22 = sadd.s32 1, %s1367_s18 }
  0x23   : > { %2015 = sst [smem:[#allocation32_spill]] %s1343_s12  ;;  %p1987_p5 = scmp.eq.s32.totalorder %s1504_s20, 0 }
  0x24   : > { %2016 = sst [smem:[#allocation33_spill]] %s1363_s17  ;;  %p44_p6 = scmp.ge.s32.totalorder %s43_s22, 2 }
  0x25   : > { %s218_s23 = sadd.s32 1, %s1323_s30  ;;  %p228_p7 = scmp.ne.s32.totalorder %s1323_s30, %s1319_s29 }
  0x26   : > { %p229_p8 = scmp.eq.s32.totalorder %s1504_s20, 1  ;;  %s2097_s22 = smov (%p44_p6, %s43_s22), 0 }
  0x27   : > { %p234_p10 = scmp.ne.s32.totalorder %s1319_s29, %s1315_s0  ;;  %s213_s25 = ssub.s32 %s1367_s18, %s2097_s22 }
  0x28   : > { %p1515_p9 = por %p229_p8, %p228_p7  ;;  %p235_p11 = scmp.eq.s32.totalorder %s785_s21, 1 }
  0x29   : > { %p216_p12 = scmp.eq.s32.totalorder %s213_s25, 0  ;;  %p786_p13 = scmp.ge.s32.totalorder %s1371_s19, 1 }
  0x2a   : > { %s2017_s24 = scalar_select %p1515_p9, 1, 0 }
  0x2b   : > { %p1524_p0 = por %p235_p11, %p234_p10  ;;  %p242_p1 = scmp.lt.s32.totalorder %s1371_s19, 3 }
  0x2c   : > { %2018 = sst [smem:[#allocation34_spill]] %s2017_s24  ;;  %s1374_s7 = smov [#allocation12]  }
  0x2d   : > { %s2019_s26 = scalar_select %p1524_p0, 1, 0 }
  0x2e   : > { %s1530_s27 = scalar_select %p216_p12, %s1323_s30, %s218_s23  }
  0x2f   : > { %2020 = sst [smem:[#allocation35_spill]] %s2019_s26  ;;  %p1532_p2 = pnand %p786_p13, %p242_p1 }
  0x30   : > { %2021 = sst [smem:[#allocation36_spill]] %s1530_s27  ;;  %s268_s0 = sshll.u32 %s1374_s7, 4  ;;  %s269_s0 = int_to_ptr.vmem [resolvable:$true] %s268_s0 }
  0x31   : > { %s2022_s28 = scalar_select %p1532_p2, 1, 0 }
  0x32   : > { %p851_p3 = pneg %p1532_p2  ;;  %s2025_s5 = sld [smem:[#allocation43_spill]] }
  0x33   : > { %2023 = sst [smem:[#allocation37_spill]] %s2022_s28 }
  0x34   : > { %p1540_p4 = pnand %p851_p3, %p1987_p5 }
  0x36   : > { %s2024_s21 = scalar_select %p1540_p4, 1, 0 }
  0x37   : > { %p1554_p10 = pneg %p1540_p4 }
  0x38   : > { %s1038_s27 = scalar_lea.hbm %s2025_s5, 768 }
  0x39   : > { %p1039_p8 = scmp.ne.s32.totalorder %s2025_s5, %s1038_s27  ;;  %p1045_p13 = scmp.lt.u32.totalorder %s1038_s27, %s2025_s5 }
  0x3b   : > { %p1041_p11 = pnand %p1554_p10, %p1039_p8 }
  0x3d   : > { %p1042_p12 = pneg %p1041_p11 }
  0x3f   : > { %p1047_p1 = pnand %p1045_p13, %p1042_p12 }
  0x41   : > { %1050 = shalt.err (!%p1047_p1)
}
  0x42   : > { %s1051_s23 = scalar_lea.vmem %s269_s0, 768  ;;  %p1059_p5 = scmp.lt.s32.totalorder %s269_s0, %s269_s0 }
  0x43   : > { %p1052_p3 = scmp.ne.s32.totalorder %s269_s0, %s1051_s23  ;;  %p1060_p0 = scmp.lt.s32.totalorder %s1051_s23, %s1051_s23 }
  0x45   : > { %p1054_p6 = pnand %p1052_p3, %p1554_p10  ;;  %p1061_p9 = por %p1060_p0, %p1059_p5 }
  0x47   : > { %p1055_p7 = pneg %p1054_p6 }
  0x49   : > { %p1062_p2 = pnand %p1061_p9, %p1055_p7 }
  0x4b   : > { %1065 = shalt.err (!%p1062_p2)
}
  0x4c   : > { %s1993_s30 = smov 128   ;;  %s1995_s29 = smov 8  }
  0x4d   : > { %857 = dma.hbm_to_vmem [thread:$0]  (!%p1540_p4), %s2025_s5, 768, %s269_s0, [#allocation13], %s1993_s30, %s1993_s30, %s1995_s29  }
  0x4e   : > { %p2001_p5 = scmp.eq.s32.totalorder %s1371_s19, 0  ;;  %s101_s27 = sld [smem:[#allocation3 + %s1367_s18]] }
  0x4f   : > { %s102_s25 = sld [smem:[#allocation3 + %s2097_s22]]  ;;  %s108_s23 = sadd.s32 1, %s1347_s13 }
  0x50   : > { %p115_p9 = scmp.ne.s32.totalorder %s1347_s13, %s1343_s12  ;;  %p121_p0 = scmp.ne.s32.totalorder %s1343_s12, %s1339_s11 }
  0x51   : > { %s324_s28 = sand.u32 1, %s1347_s13   ;;  %p2028_p6 = scmp.eq.s32.totalorder %s1504_s20, 0 }
  0x52   : > { %p1585_p2 = por %p115_p9, %p2001_p5  ;;  %s794_s24 = sshll.u32 %s324_s28, 4 }
  0x53   : > { %p1591_p7 = por %p121_p0, %p2028_p6  ;;  %p2031_p8 = scmp.lt.s32.totalorder %s1371_s19, 2 }
  0x54   : > { %s326_s30 = scalar_lea.vmem [#allocation9], %s794_s24  ;;  %s2035_s1 = sld [smem:[#allocation39_spill]] }
  0x55   : > { %s2029_s0 = scalar_select %p1591_p7, 1, 0 }
  0x56   : > { %p1599_p11 = pnand %p2031_p8, %p1585_p2  ;;  %s103_s26 = ssub.s32 %s101_s27, %s102_s25 }
  0x57   : > { %2030 = sst [smem:[#allocation38_spill]] %s2029_s0  ;;  %s335_s29 = sshll.u32 %s326_s30, 4  ;;  %s1603_s29 = int_to_ptr.vmem [resolvable:$true] %s335_s29 }
  0x58   : > { %p106_p12 = scmp.eq.s32.totalorder %s103_s26, 0  ;;  %p2033_p13 = pmov %p2031_p8 }
  0x59   : > { %s834_s17 = scalar_select %p1585_p2, [#allocation3], [#allocation17] }
  0x5a   : > { %s1608_s5 = scalar_select %p106_p12, %s1347_s13, %s108_s23  }
  0x5b   : > { %s835_s0 = scalar_select %p1585_p2, %s1367_s18, 0 }
  0x5c   : > { %s2099_s17 = smov (!%p2033_p13, %s834_s17), [#allocation20]  ;;  %p2034_p1 = pmov %p2031_p8 }
  0x5d   : > { %s255_s27 = sshll.u32 %s2035_s1, 4  ;;  %s256_s27 = int_to_ptr.vmem [resolvable:$true] %s255_s27 }
  0x5e   : > { %s2101_s0 = smov (!%p2034_p1, %s835_s0), 0  ;;  %s1066_s30 = scalar_lea.vmem %s256_s27, 128 }
  0x5f   : > { %s327_s28 = sld [smem:[%s2099_s17 + %s2101_s0]]  ;;  %p1067_p3 = scmp.ne.s32.totalorder %s256_s27, %s1066_s30 }
  0x60   : > { %p1074_p6 = scmp.lt.s32.totalorder %s256_s27, %s256_s27  ;;  %p1075_p8 = scmp.lt.s32.totalorder %s1066_s30, %s1066_s30 }
  0x61   : > { %p1069_p9 = pnand %p1067_p3, %p1554_p10 }
  0x62   : > { %p1076_p12 = por %p1075_p8, %p1074_p6 }
  0x63   : > { %p1070_p0 = pneg %p1069_p9 }
  0x65   : > { %p1077_p5 = pnand %p1076_p12, %p1070_p0 }
  0x67   : > { %1080 = shalt.err (!%p1077_p5)
}
  0x68   : > { %s1377_s4 = smov [#allocation4]   ;;  %s1378_s2 = smov [#allocation14]  }
  0x69   : > { %854 = dma.vmem_to_smem (!%p1540_p4), %s256_s27, 128, %s1377_s4, [#allocation7]  }
  0x6a   : > { %s284_s12 = sshll.u32 %s1378_s2, 4  ;;  %s819_s17 = sshll.u32 %s327_s28, 8  ;;  %s1624_s12 = int_to_ptr.vmem [resolvable:$true] %s284_s12 }
  0x6b   : > { %s2036_s3 = sld [smem:[#allocation41_spill]]  ;;  %s2037_s24 = sand.u32 1, %s1371_s19  }
  0x6c   : > { %s1633_s26 = scalar_lea.sflag [#allocation10], %s2037_s24  ;;  %p1083_p2 = pneg %p1599_p11 }
  0x71   : > { %s1629_s0 = scalar_lea.hbm %s2036_s3, %s819_s17  ;;  %s1086_s4 = scalar_lea.hbm %s2036_s3, 2048 }
  0x72   : > { %s1081_s30 = scalar_lea.hbm %s1629_s0, 256  ;;  %p1087_p3 = scmp.lt.u32.totalorder %s1629_s0, %s2036_s3 }
  0x73   : > { %p1082_p5 = scmp.ne.s32.totalorder %s1629_s0, %s1081_s30  ;;  %p1088_p9 = scmp.lt.u32.totalorder %s1086_s4, %s1081_s30 }
  0x74   : > { %p1090_p6 = scmp.lt.u32.totalorder %s1081_s30, %s1629_s0 }
  0x75   : > { %p1084_p13 = pnand %p1083_p2, %p1082_p5  ;;  %p1089_p0 = por %p1088_p9, %p1087_p3 }
  0x77   : > { %p1085_p1 = pneg %p1084_p13  ;;  %p1091_p8 = por %p1090_p6, %p1089_p0 }
  0x79   : > { %p1092_p12 = pnand %p1091_p8, %p1085_p1 }
  0x7b   : > { %1095 = shalt.err (!%p1092_p12)
}
  0x7c   : > { %s1096_s25 = scalar_lea.vmem %s1603_s29, 256  ;;  %s1379_s23 = smov [#allocation9]  }
  0x7d   : > { %p1097_p5 = scmp.ne.s32.totalorder %s1603_s29, %s1096_s25  ;;  %s1101_s24 = sshll.u32 %s1379_s23, 4  ;;  %s1102_s24 = int_to_ptr.vmem [resolvable:$false] %s1101_s24 }
  0x7e   : > { %s1103_s28 = scalar_lea.vmem %s1102_s24, 512  ;;  %p1104_p4 = scmp.lt.s32.totalorder %s1603_s29, %s1102_s24 }
  0x7f   : > { %p1099_p13 = pnand %p1097_p5, %p1083_p2  ;;  %p1105_p3 = scmp.lt.s32.totalorder %s1103_s28, %s1096_s25 }
  0x81   : > { %p1100_p7 = pneg %p1099_p13  ;;  %p1106_p9 = por %p1105_p3, %p1104_p4 }
  0x83   : > { %p1107_p0 = pnand %p1106_p9, %p1100_p7 }
  0x85   : > { %1110 = shalt.err (!%p1107_p0)
}
  0x86   : > { %s2038_s30 = smov 8   ;;  %s2039_s27 = smov 128  }
  0x87   : > { %871 = dma.hbm_to_vmem [thread:$0]  (!%p1599_p11), %s1629_s0, 256, %s1603_s29, %s1633_s26, %s2039_s27, %s2039_s27, %s2038_s30  }
  0x88   : > { %s2040_s6 = sld [smem:[#allocation44_spill]] }
  0x8e   : > { %s1111_s17 = scalar_lea.hbm %s2040_s6, 1536 }
  0x8f   : > { %p1112_p4 = scmp.ne.s32.totalorder %s2040_s6, %s1111_s17  ;;  %p1118_p1 = scmp.lt.u32.totalorder %s1111_s17, %s2040_s6 }
  0x91   : > { %p1114_p7 = pnand %p1112_p4, %p1554_p10 }
  0x93   : > { %p1115_p2 = pneg %p1114_p7 }
  0x95   : > { %p1120_p6 = pnand %p1118_p1, %p1115_p2 }
  0x97   : > { %1123 = shalt.err (!%p1120_p6)
}
  0x98   : > { %s1124_s29 = scalar_lea.vmem %s1624_s12, 1536  ;;  %p1132_p5 = scmp.lt.s32.totalorder %s1624_s12, %s1624_s12 }
  0x99   : > { %p1125_p11 = scmp.ne.s32.totalorder %s1624_s12, %s1124_s29  ;;  %p1133_p13 = scmp.lt.s32.totalorder %s1124_s29, %s1124_s29 }
  0x9b   : > { %p1127_p8 = pnand %p1125_p11, %p1554_p10  ;;  %p1134_p3 = por %p1133_p13, %p1132_p5 }
  0x9d   : > { %p1128_p12 = pneg %p1127_p8 }
  0x9f   : > { %p1135_p9 = pnand %p1134_p3, %p1128_p12 }
  0xa1   : > { %1138 = shalt.err (!%p1135_p9)
}
  0xa2   : > { %p2041_p0 = scmp.ne.s32.totalorder %s2024_s21, 0  ;;  %s71_s21 = sld [smem:[#allocation3 + %s1367_s18]] }
  0xa3   : > { %s72_s7 = sld [smem:[#allocation3 + %s2097_s22]]  ;;  %p85_p10 = scmp.ne.s32.totalorder %s1359_s16, %s1355_s15 }
  0xa4   : > { %860 = dma.hbm_to_vmem [thread:$0]  (!%p2041_p0), %s2040_s6, 1536, %s1624_s12, [#allocation13], %s2039_s27, %s2039_s27, %s2038_s30  }
  0xa5   : > { %p91_p4 = scmp.ne.s32.totalorder %s1355_s15, %s1351_s14  ;;  %s298_s4 = sand.u32 1, %s1359_s16  }
  0xa6   : > { %s78_s2 = sadd.s32 1, %s1359_s16  ;;  %p2042_p7 = scmp.eq.s32.totalorder %s1371_s19, 0 }
  0xa7   : > { %p2043_p1 = scmp.eq.s32.totalorder %s1504_s20, 0  ;;  %s791_s12 = sshll.u32 %s298_s4, 4 }
  0xa8   : > { %p87_p2 = por %p2042_p7, %p85_p10  ;;  %p2045_p11 = scmp.lt.s32.totalorder %s1371_s19, 2 }
  0xa9   : > { %p1702_p6 = por %p2043_p1, %p91_p4  ;;  %s73_s23 = ssub.s32 %s71_s21, %s72_s7 }
  0xaa   : > { %p1708_p8 = pnand %p2045_p11, %p87_p2  ;;  %p76_p12 = scmp.eq.s32.totalorder %s73_s23, 0 }
  0xab   : > { %s302_s24 = scalar_lea.vmem [#allocation8], %s791_s12  ;;  %p2047_p5 = pmov %p2045_p11 }
  0xac   : > { %s312_s11 = sshll.u32 %s302_s24, 4  ;;  %s1721_s21 = sld [smem:[#allocation3 + %s1367_s18]]  ;;  %s1726_s11 = int_to_ptr.vmem [resolvable:$true] %s312_s11 }
  0xad   : > { %s831_s25 = scalar_select %p87_p2, [#allocation3], [#allocation16] }
  0xae   : > { %s1713_s29 = scalar_select %p76_p12, %s1359_s16, %s78_s2  }
  0xaf   : > { %s832_s0 = scalar_select %p87_p2, %s1367_s18, 0 }
  0xb0   : > { %s2103_s25 = smov (!%p2047_p5, %s831_s25), [#allocation19]  ;;  %p2048_p13 = pmov %p2047_p5 }
  0xb1   : > { %s1724_s7 = sld [smem:[#allocation3 + %s2097_s22]]  ;;  %p151_p9 = scmp.ne.s32.totalorder %s1331_s9, %s1327_s8 }
  0xb2   : > { %s2105_s0 = smov (!%p2048_p13, %s832_s0), 0  ;;  %s347_s2 = sand.u32 1, %s1335_s10  }
  0xb3   : > { %s303_s28 = sld [smem:[%s2103_s25 + %s2105_s0]]  ;;  %p2050_p0 = pmov %p2043_p1 }
  0xb4   : > { %s2049_s3 = sld [smem:[#allocation40_spill]]  ;;  %s1745_s0 = scalar_lea.sflag [#allocation5], %s298_s4 }
  0xb5   : > { %p1741_p10 = por %p151_p9, %p2050_p0  ;;  %p1141_p7 = pneg %p1708_p8 }
  0xb7   : > { %s2051_s25 = scalar_select %p1741_p10, 1, 0 }
  0xb9   : > { %s818_s23 = sshll.u32 %s303_s28, 8 }
  0xba   : > { %s1737_s6 = scalar_lea.hbm %s2049_s3, %s818_s23  ;;  %s1144_s28 = scalar_lea.hbm %s2049_s3, 2048 }
  0xbb   : > { %s1139_s12 = scalar_lea.hbm %s1737_s6, 256  ;;  %p1145_p11 = scmp.lt.u32.totalorder %s1737_s6, %s2049_s3 }
  0xbc   : > { %p1140_p4 = scmp.ne.s32.totalorder %s1737_s6, %s1139_s12  ;;  %p1146_p12 = scmp.lt.u32.totalorder %s1144_s28, %s1139_s12 }
  0xbd   : > { %p1148_p13 = scmp.lt.u32.totalorder %s1139_s12, %s1737_s6 }
  0xbe   : > { %p1142_p2 = pnand %p1141_p7, %p1140_p4  ;;  %p1147_p5 = por %p1146_p12, %p1145_p11 }
  0xc0   : > { %p1143_p1 = pneg %p1142_p2  ;;  %p1149_p9 = por %p1148_p13, %p1147_p5 }
  0xc2   : > { %p1150_p0 = pnand %p1149_p9, %p1143_p1 }
  0xc4   : > { %1153 = shalt.err (!%p1150_p0)
}
  0xc5   : > { %s1154_s4 = scalar_lea.vmem %s1726_s11, 256  ;;  %s1380_s1 = smov [#allocation8]  }
  0xc6   : > { %p1155_p4 = scmp.ne.s32.totalorder %s1726_s11, %s1154_s4  ;;  %s1159_s8 = sshll.u32 %s1380_s1, 4  ;;  %s1160_s8 = int_to_ptr.vmem [resolvable:$false] %s1159_s8 }
  0xc7   : > { %s1161_s23 = scalar_lea.vmem %s1160_s8, 512  ;;  %p1162_p10 = scmp.lt.s32.totalorder %s1726_s11, %s1160_s8 }
  0xc8   : > { %p1157_p2 = pnand %p1155_p4, %p1141_p7  ;;  %p1163_p11 = scmp.lt.s32.totalorder %s1161_s23, %s1154_s4 }
  0xca   : > { %p1158_p3 = pneg %p1157_p2  ;;  %p1164_p12 = por %p1163_p11, %p1162_p10 }
  0xcc   : > { %p1165_p5 = pnand %p1164_p12, %p1158_p3 }
  0xce   : > { %1168 = shalt.err (!%p1165_p5)
}
  0xcf   : > { %866 = dma.hbm_to_vmem [thread:$0]  (!%p1708_p8), %s1737_s6, 256, %s1726_s11, %s1745_s0, %s2039_s27, %s2039_s27, %s2038_s30  }
  0xd0   : > { %s133_s14 = ssub.s32 %s1721_s21, %s1724_s7  ;;  %p2052_p3 = scmp.eq.s32.totalorder %s1371_s19, 0 }
  0xd1   : > { %p2053_p10 = scmp.ne.s32.totalorder %s1335_s10, %s1331_s9  ;;  %p136_p1 = scmp.eq.s32.totalorder %s133_s14, 0 }
  0xd2   : > { %s820_s12 = smul.u32 48, %s347_s2  ;;  %p2054_p13 = scmp.lt.s32.totalorder %s1371_s19, 2 }
  0xd3   : > { %p147_p7 = por %p2053_p10, %p2052_p3  ;;  %s2056_s24 = sadd.s32 1, %s1335_s10 }
  0xd4   : > { %s1794_s4 = scalar_select %p136_p1, %s1335_s10, %s2056_s24  }
  0xd5   : > { %p1787_p9 = pnand %p2054_p13, %p147_p7  ;;  %p2057_p8 = pmov %p2054_p13 }
  0xd6   : > { %s837_s1 = scalar_select %p147_p7, [#allocation3], [#allocation18] }
  0xd7   : > { %s838_s8 = scalar_select %p147_p7, %s1367_s18, 0 }
  0xd8   : > { %s2107_s1 = smov (!%p2057_p8, %s837_s1), [#allocation21]  ;;  %p2058_p0 = pmov %p2057_p8 }
  0xd9   : > { %s349_s11 = scalar_lea.vmem [#allocation11], %s820_s12  ;;  %s2059_s23 = sld [smem:[#allocation42_spill]] }
  0xda   : > { %s2109_s8 = smov (!%p2058_p0, %s838_s8), 0  ;;  %s359_s21 = sshll.u32 %s349_s11, 4  ;;  %s1801_s21 = int_to_ptr.vmem [resolvable:$true] %s359_s21 }
  0xdb   : > { %s350_s6 = sld [smem:[%s2107_s1 + %s2109_s8]]  ;;  %p1171_p2 = pneg %p1787_p9 }
  0xdf   : > { %s1174_s8 = scalar_lea.hbm %s2059_s23, 6144 }
  0xe1   : > { %s821_s7 = smul.u32 768, %s350_s6 }
  0xe3   : > { %s1806_s14 = scalar_lea.hbm %s2059_s23, %s821_s7 }
  0xe4   : > { %s1169_s24 = scalar_lea.hbm %s1806_s14, 768  ;;  %p1175_p5 = scmp.lt.u32.totalorder %s1806_s14, %s2059_s23 }
  0xe5   : > { %p1170_p4 = scmp.ne.s32.totalorder %s1806_s14, %s1169_s24  ;;  %p1176_p3 = scmp.lt.u32.totalorder %s1174_s8, %s1169_s24 }
  0xe6   : > { %p1178_p7 = scmp.lt.u32.totalorder %s1169_s24, %s1806_s14 }
  0xe7   : > { %p1172_p11 = pnand %p1171_p2, %p1170_p4  ;;  %p1177_p10 = por %p1176_p3, %p1175_p5 }
  0xe9   : > { %p1173_p12 = pneg %p1172_p11  ;;  %p1179_p1 = por %p1178_p7, %p1177_p10 }
  0xeb   : > { %p1180_p13 = pnand %p1179_p1, %p1173_p12 }
  0xed   : > { %1183 = shalt.err (!%p1180_p13)
}
  0xee   : > { %s1184_s7 = scalar_lea.vmem %s1801_s21, 768  ;;  %s1381_s2 = smov [#allocation11]  }
  0xef   : > { %p1185_p8 = scmp.ne.s32.totalorder %s1801_s21, %s1184_s7  ;;  %s1189_s0 = sshll.u32 %s1381_s2, 4  ;;  %s1190_s0 = int_to_ptr.vmem [resolvable:$false] %s1189_s0 }
  0xf0   : > { %s1191_s12 = scalar_lea.vmem %s1190_s0, 1536  ;;  %p1192_p11 = scmp.lt.s32.totalorder %s1801_s21, %s1190_s0 }
  0xf1   : > { %p1187_p0 = pnand %p1185_p8, %p1171_p2  ;;  %p1193_p5 = scmp.lt.s32.totalorder %s1191_s12, %s1184_s7 }
  0xf3   : > { %p1188_p4 = pneg %p1187_p0  ;;  %p1194_p3 = por %p1193_p5, %p1192_p11 }
  0xf5   : > { %p1195_p10 = pnand %p1194_p3, %p1188_p4 }
  0xf7   : > { %1198 = shalt.err (!%p1195_p10)
}
  0xf8   : > { %876 = dma.hbm_to_vmem [thread:$0]  (!%p1787_p9), %s1806_s14, 768, %s1801_s21, %s1633_s26, %s2039_s27, %s2039_s27, %s2038_s30  }
  0xf9   : > { %s2060_s24 = sld [smem:[#allocation37_spill]] }
  0xff   : > { %p2061_p2 = scmp.ne.s32.totalorder %s2060_s24, 0 }
 0x100   : > { %p2062_p12 = scmp.eq.s32.totalorder (!%p2061_p2), %s1504_s20, 0 }
 0x101   : > { %371 = sbr.rel (%p2061_p2) target bundleno = 474 (0x1da), region = 44 }
 0x108   : > { %1290 = dma.done.wait (%p2062_p12), [#allocation7], 128   ;;  %p2063_p7 = pmov %p2062_p12 }
 0x109   : > { %s377_s1 = sand.u32 1, %s1355_s15  }
 0x10a   : > { %1292 = vsyncadd (%p2063_p7), [#allocation7], 4294967168  ;;  %s800_s28 = sshll.u32 %s377_s1, 4  ;;  %s378_s8 = scalar_lea.sflag [#allocation5], %s377_s1 }
 0x10b   : > { %s381_s6 = scalar_lea.vmem [#allocation8], %s800_s28 }
 0x10c   : > { %1294 = dma.done.wait (%p1702_p6), %s378_s8, 256  }
 0x10d   : > { %1296 = vsyncadd (%p1702_p6), %s378_s8, 4294967040  ;;  %s2064_s26 = sld [smem:[#allocation32_spill]]  ;;  %s2065_s30 = sld [smem:[#allocation38_spill]] }
 0x10e   : > { %s386_s27 = sand.u32 1, %s1504_s20  }
 0x10f   : > { %s387_s11 = scalar_lea.sflag [#allocation10], %s386_s27 }
 0x113   : > { %s388_s21 = sand.u32 1, %s2064_s26   ;;  %p2066_p9 = scmp.ne.s32.totalorder %s2065_s30, 0 }
 0x114   : > { %s801_s14 = sshll.u32 %s388_s21, 4 }
 0x115   : > { %s390_s7 = scalar_lea.vmem [#allocation9], %s801_s14 }
 0x116   : > { %1298 = dma.done.wait (%p2066_p9), %s387_s11, 256  }
 0x117   : > { %1300 = vsyncadd (%p2066_p9), %s387_s11, 4294967040  ;;  %s397_s2 = sand.u32 1, %s1331_s9   ;;  %p2067_p6 = scmp.ne.s32.totalorder %s2051_s25, 0 }
 0x118   : > { %s822_s0 = smul.u32 48, %s397_s2 }
 0x11a   : > { %s1855_s12 = scalar_lea.vmem [#allocation11], %s822_s0 }
 0x11b   : > { %1302 = dma.done.wait (%p2067_p6), %s387_s11, 768  }
 0x11c   : > { %1304 = vsyncadd (%p2067_p6), %s387_s11, 4294966528  ;;  %p2068_p1 = pmov %p2063_p7 }
 0x11e   : > { %1306 = dma.done.wait (%p2068_p1), [#allocation13], 2304   ;;  %p2069_p13 = pmov %p2068_p1 }
 0x120   : > { %1308 = vsyncadd (%p2069_p13), [#allocation13], 4294964992 }
 0x121   : > { %412 = sfence }
 0x122   : > { %v458_v0 = vld [vmem:[%s390_s7] sm:$0xff]  ;;  %s2070_s17 = sld [smem:[#allocation33_spill]]  ;;  %v459_v1 = vld [vmem:[%s390_s7 + $0x8] sm:$0xff]  ;;  %s2071_s8 = sld [smem:[#allocation30_spill]]  ;;  %v807_v58 = vld [vmem:[%s1855_s12 + $0x10] sm:$0xff]  ;;  %vm537_vm0 = vcmask 130048  }
 0x123   : > { %460 = vxpose.xlu0.b32.start [1/2] (short) (narrow) %v458_v0, 16  ;;  %v456_v2 = vld [vmem:[%s381_s6] sm:$0xff]  ;;  %v457_v5 = vld [vmem:[%s381_s6 + $0x8] sm:$0xff]  ;;  %s2072_s14 = sld [smem:[#allocation34_spill]]  ;;  %s2073_s2 = sld [smem:[#allocation45_spill]] }
 0x124   : > { %v514_v10 = vld [vmem:[#allocation14] sm:$0xff]  ;;  %v544_v14 = vld [vmem:[#allocation14 + $0x10] sm:$0xff]  ;;  %v515_v18 = vld [vmem:[#allocation14 + $0x8] sm:$0xff] }
 0x125   : > { %v573_v15 = vld [vmem:[#allocation14 + $0x20] sm:$0xff]  ;;  %v512_v17 = vld [vmem:[#allocation12] sm:$0xff]  ;;  %v545_v23 = vld [vmem:[#allocation14 + $0x18] sm:$0xff] }
 0x126   : > { %v522_v19 = vld [vmem:[#allocation14 + $0x30] sm:$0xff]  ;;  %v541_v22 = vld [vmem:[#allocation12 + $0x10] sm:$0xff]  ;;  %v574_v25 = vld [vmem:[#allocation14 + $0x28] sm:$0xff] }
 0x127   : > { %461 = vxpose.xlu0.b32.end [2/2] (short) (narrow) %v459_v1, 16  ;;  %v551_v28 = vld [vmem:[#allocation14 + $0x40] sm:$0xff]  ;;  %v570_v29 = vld [vmem:[#allocation12 + $0x20] sm:$0xff]  ;;  %v513_v33 = vld [vmem:[#allocation12 + $0x8] sm:$0xff] }
 0x128   : > { %s455_s24 = sld [smem:[#allocation3 + %s2070_s17]]  ;;  %v580_v30 = vld [vmem:[#allocation14 + $0x50] sm:$0xff]  ;;  %v523_v34 = vld [vmem:[#allocation14 + $0x38] sm:$0xff]  ;;  %v542_v36 = vld [vmem:[#allocation12 + $0x18] sm:$0xff]  ;;  %s444_s6 = sand.u32 1, %s2071_s8  }
 0x129   : > { %v552_v40 = vld [vmem:[#allocation14 + $0x48] sm:$0xff]  ;;  %v571_v42 = vld [vmem:[#allocation12 + $0x28] sm:$0xff]  ;;  %s823_s26 = smul.u32 48, %s444_s6  ;;  %v531_v56 = vld [vmem:[%s1855_s12] sm:$0xff]  ;;  %p2074_p0 = scmp.ne.s32.totalorder %s2072_s14, 0 }
 0x12a   : > { %v581_v44 = vld [vmem:[#allocation14 + $0x58] sm:$0xff]  ;;  %v811_v59 = vld [vmem:[%s1855_s12 + $0x20] sm:$0xff]  ;;  %s824_s30 = smul.u32 768, %s2070_s17 }
 0x12b   : > { %v532_v0 = vld [vmem:[%s1855_s12 + $0x8] sm:$0xff]  ;;  %s446_s27 = scalar_lea.vmem [#allocation15], %s823_s26 }
 0x12c   : > { %s614_s21 = sshll.u32 %s446_s27, 4  ;;  %s1882_s0 = scalar_lea.hbm %s2073_s2, %s824_s30  ;;  %s1884_s21 = int_to_ptr.vmem [resolvable:$true] %s614_s21 }
 0x12d   : > { %s1199_s17 = scalar_lea.vmem %s1884_s21, 768 }
 0x12e   : > { %s806_s25 = sshll.u32 %s455_s24, 7  ;;  %p1200_p8 = scmp.ne.s32.totalorder %s1884_s21, %s1199_s17 }
 0x12f   : > { %s509_s1 = sld [smem:[#allocation4 + %s806_s25]]  ;;  %s510_s20 = sadd.s32 1, %s806_s25 }
 0x130   : > { %s511_s28 = sld [smem:[#allocation4 + %s510_s20]]  ;;  %p1201_p4 = pnand %p1200_p8, %p2074_p0 }
 0x131   : > { %s1382_s24 = smov [#allocation15]  }
 0x132   : > { %p1202_p11 = pneg %p1201_p4  ;;  %s1203_s25 = sshll.u32 %s1382_s24, 4  ;;  %s1204_s25 = int_to_ptr.vmem [resolvable:$false] %s1203_s25 }
 0x133   : > { %p1206_p5 = scmp.lt.s32.totalorder %s1884_s21, %s1204_s25 }
 0x135   : > { %v516_v11 = vstv %s509_s1  ;;  %s1205_s1 = scalar_lea.vmem %s1204_s25, 1536 }
 0x136   : > { %v517_v16 = vmul.f32 %v516_v11, %v514_v10  ;;  %v524_v21 = vstv %s511_s28  ;;  %v546_v24 = vmul.f32 %v544_v14, %v516_v11  ;;  %v575_v26 = vmul.f32 %v573_v15, %v516_v11  ;;  %p1207_p3 = scmp.lt.s32.totalorder %s1205_s1, %s1199_s17 }
 0x137   : > { %v518_v31 = vmul.f32 %v516_v11, %v515_v18  ;;  %v525_v35 = vmul.f32 %v524_v21, %v522_v19  ;;  %v547_v37 = vmul.f32 %v545_v23, %v516_v11  ;;  %v576_v38 = vmul.f32 %v574_v25, %v516_v11 }
 0x138   : > { %v519_v32 = vadd.f32 %v517_v16, %v512_v17  ;;  %v548_v39 = vadd.f32 %v546_v24, %v541_v22  ;;  %v553_v41 = vmul.f32 %v551_v28, %v524_v21  ;;  %v577_v43 = vadd.f32 %v575_v26, %v570_v29  ;;  %p1208_p10 = por %p1207_p3, %p1206_p5 }
 0x139   : > { %v582_v45 = vmul.f32 %v580_v30, %v524_v21  ;;  %v520_v46 = vadd.f32 %v518_v31, %v513_v33  ;;  %v526_v47 = vmul.f32 %v524_v21, %v523_v34  ;;  %v549_v48 = vadd.f32 %v547_v37, %v542_v36 }
 0x13a   : > { %v554_v49 = vmul.f32 %v552_v40, %v524_v21  ;;  %v578_v50 = vadd.f32 %v576_v38, %v571_v42  ;;  %v583_v51 = vmul.f32 %v581_v44, %v524_v21  ;;  %v527_v52 = vadd.f32 %v525_v35, %v519_v32  ;;  %p1209_p2 = pnand %p1208_p10, %p1202_p11 }
 0x13b   : > { %v555_v53 = vadd.f32 %v553_v41, %v548_v39  ;;  %v584_v54 = vadd.f32 %v582_v45, %v577_v43  ;;  %v528_v60 = vadd.f32 %v526_v47, %v520_v46 }
 0x13c   : > { %v556_v61 = vadd.f32 %v554_v49, %v549_v48  ;;  %v585_v62 = vadd.f32 %v583_v51, %v578_v50 }
 0x1a3   : > { %v476_v3 = vpop.trf.xlu0 }
 0x1a4   : > { %v492_v4 = vadd.f32 %v476_v3, %v456_v2  ;;  %v808_v3 = vld [vmem:[%s1855_s12 + $0x18] sm:$0xff] }
 0x1a6   : > { %v804_v6 = vmul.f32 -1.442695, %v492_v4 }
 0x1a7   : > { %v477_v7 = vpop.trf.xlu0 }
 0x1a8   : > { %1018 = vpow2.f32 %v804_v6  ;;  %v493_v8 = vadd.f32 %v477_v7, %v457_v5  ;;  %v812_v7 = vld [vmem:[%s1855_s12 + $0x28] sm:$0xff]  ;;  %s1891_s12 = scalar_lea.sflag [#allocation6], %s444_s6 }
 0x1aa   : > { %v805_v9 = vmul.f32 -1.442695, %v493_v8 }
 0x1ac   : > { %1020 = vpow2.f32 %v805_v9 }
 0x1b2   : > { %v1019_v12 = vpop.eup %1018 }
 0x1b3   : > { %v500_v13 = vadd.f32 1.0, %v1019_v12 }
 0x1b5   : > { %1022 = vrcp.f32 %v500_v13 }
 0x1b6   : > { %v1021_v20 = vpop.eup %1020 }
 0x1b7   : > { %v501_v27 = vadd.f32 1.0, %v1021_v20 }
 0x1b9   : > { %1024 = vrcp.f32 %v501_v27 }
 0x1bf   : > { %v1023_v55 = vpop.eup %1022 }
 0x1c0   : > { %v506_v57 = vsub.f32 1.0, %v1023_v55  ;;  %v533_v1 = vmul.f32 %v1023_v55, %v531_v56  ;;  %v562_v6 = vmul.f32 %v1023_v55, %v807_v58  ;;  %v591_v8 = vmul.f32 %v1023_v55, %v811_v59 }
 0x1c2   : > { %v529_v63 = vmul.f32 %v527_v52, %v506_v57  ;;  %v557_v2 = vmul.f32 %v555_v53, %v506_v57  ;;  %v586_v4 = vmul.f32 %v584_v54, %v506_v57 }
 0x1c3   : > { %v1025_v5 = vpop.eup %1024 }
 0x1c4   : > { %v507_v9 = vsub.f32 1.0, %v1025_v5  ;;  %v535_v10 = vadd.f32 %v533_v1, %v529_v63  ;;  %v534_v11 = vmul.f32 %v1025_v5, %v532_v0  ;;  %v563_v12 = vmul.f32 %v1025_v5, %v808_v3 }
 0x1c5   : > { %v564_v13 = vadd.f32 %v562_v6, %v557_v2  ;;  %v593_v14 = vadd.f32 %v591_v8, %v586_v4  ;;  %v592_v18 = vmul.f32 %v1025_v5, %v812_v7 }
 0x1c6   : > { %v530_v15 = vmul.f32 %v528_v60, %v507_v9  ;;  %538 = vst.msk [vmem:[%s446_s27] sm:$0xff] %vm537_vm0, %v535_v10  ;;  %v558_v16 = vmul.f32 %v556_v61, %v507_v9  ;;  %v587_v17 = vmul.f32 %v585_v62, %v507_v9 }
 0x1c7   : > { %809 = vst.msk [vmem:[%s446_s27 + $0x10] sm:$0xff] %vm537_vm0, %v564_v13  ;;  %813 = vst.msk [vmem:[%s446_s27 + $0x20] sm:$0xff] %vm537_vm0, %v593_v14 }
 0x1c8   : > { %v536_v19 = vadd.f32 %v534_v11, %v530_v15  ;;  %v565_v20 = vadd.f32 %v563_v12, %v558_v16  ;;  %v594_v21 = vadd.f32 %v592_v18, %v587_v17 }
 0x1ca   : > { %539 = vst.msk [vmem:[%s446_s27 + $0x8] sm:$0xff] %vm537_vm0, %v536_v19  ;;  %810 = vst.msk [vmem:[%s446_s27 + $0x18] sm:$0xff] %vm537_vm0, %v565_v20 }
 0x1cb   : > { %814 = vst.msk [vmem:[%s446_s27 + $0x28] sm:$0xff] %vm537_vm0, %v594_v21 }
 0x1cc   : > { %1212 = shalt.err (!%p1209_p2)
}
 0x1cd   : > { %s1213_s20 = scalar_lea.hbm %s1882_s0, 768  ;;  %s1217_s6 = scalar_lea.hbm %s2073_s2, 1536 }
 0x1ce   : > { %p1214_p12 = scmp.ne.s32.totalorder %s1882_s0, %s1213_s20  ;;  %p1218_p6 = scmp.lt.u32.totalorder %s1882_s0, %s2073_s2 }
 0x1cf   : > { %p1219_p1 = scmp.lt.u32.totalorder %s1217_s6, %s1213_s20  ;;  %p1221_p8 = scmp.lt.u32.totalorder %s1213_s20, %s1882_s0 }
 0x1d0   : > { %p1215_p7 = pnand %p1214_p12, %p2074_p0 }
 0x1d1   : > { %p1220_p13 = por %p1219_p1, %p1218_p6 }
 0x1d2   : > { %p1216_p9 = pneg %p1215_p7 }
 0x1d3   : > { %p1222_p4 = por %p1221_p8, %p1220_p13 }
 0x1d5   : > { %p1223_p11 = pnand %p1222_p4, %p1216_p9 }
 0x1d7   : > { %1226 = shalt.err (!%p1223_p11)
}
 0x1d8   : > { %s1383_s27 = smov 128   ;;  %s1384_s11 = smov 8  }
 0x1d9   : > { %849 = dma.vmem_to_hbm [thread:$0]  (%p2074_p0), %s1884_s21, 768, %s1882_s0, %s1891_s12, %s1383_s27, %s1383_s27, %s1384_s11  }
 0x1da PF: > { %s2075_s7 = sld [smem:[#allocation29_spill]]  ;;  %s2076_s17 = sld [smem:[#allocation35_spill]] }
 0x1db   : > { %p2078_p3 = scmp.ge.s32.totalorder %s1371_s19, 2 }
 0x1e0   : > { %s629_s24 = sand.u32 1, %s2075_s7   ;;  %p2077_p5 = scmp.ne.s32.totalorder %s2076_s17, 0 }
 0x1e1   : > { %s630_s25 = scalar_lea.sflag [#allocation6], %s629_s24 }
 0x1e2   : > { %p878_p10 = pnand %p2078_p3, %p2077_p5 }
 0x1e4   : > { %1310 = dma.done.wait (!%p878_p10), %s630_s25, 768  }
 0x1e5   : > { %1312 = vsyncadd (!%p878_p10), %s630_s25, 4294966528  ;;  %s34_s19 = sadd.s32 1, %s1371_s19   ;;  %s2080_s0 = sld [smem:[#allocation30_spill]] }
 0x1e6   : > { %p1921_p2 = scmp.ge.s32.totalorder %s34_s19, 4   ;;  %s2081_s14 = sld [smem:[#allocation31_spill]] }
 0x1e7   : > { %s2082_s30 = sld [smem:[#allocation36_spill]]  ;;  %s2083_s11 = sld [smem:[#allocation32_spill]] }
 0x1e8   : > { %s2084_s21 = smov %s1713_s29  ;;  %s2086_s8 = smov %s1331_s9 }
 0x1e9   : > { %s2087_s9 = smov %s1335_s10  ;;  %s2088_s10 = smov %s1794_s4 }
 0x1ea   : > { %s2089_s12 = smov %s1347_s13  ;;  %s2090_s13 = smov %s1608_s5 }
 0x1eb   : > { %s2094_s17 = smov %s1367_s18  ;;  %s2095_s18 = smov %s2097_s22 }
 0x1ec   : > { %s2085_s29 = smov %s2081_s14  ;;  %s2091_s14 = smov %s1355_s15 }
 0x1ed   : > { %s2092_s15 = smov %s1359_s16  ;;  %s2093_s16 = smov %s2084_s21 }
 0x1ee   :  { %33 = sbr.rel (!%p1921_p2) target bundleno = 32 (0x20), region = 139 }
 0x1f5   :  { %635 = vsyncpa [#allocation5], 1 }
 0x1f6   :  { %637 = vsyncpa [#allocation5 + $0x1], 1 }
 0x1f7   :  { %638 = vsyncpa [#allocation10], 1 }
 0x1f8   :  { %640 = vsyncpa [#allocation10 + $0x1], 1 }
 0x1f9   :  { %641 = vsyncpa [#allocation13], 1 }
 0x1fa   :  { %642 = vsyncpa [#allocation6], 1 }
 0x1fb   :  { %644 = vsyncpa [#allocation6 + $0x1], 1 }
 0x1fc   :  { %645 = vsyncpa [#allocation7], 1 }
 0x1fd   :  { %647 = vsyncpa [#allocation7 + $0x1], 1 }

</bundles_post_ra>
